<compile_context>
chip_gen: v7x
topology: tpu7x:2x2x1
jax: 0.10.0
libtpu: 0.0.40
codegen_flags: <defaults>
</compile_context>

<pallas_src>
import math
from functools import partial

import jax
import jax.numpy as jnp
import numpy as np
from jax.experimental import pallas as pl
from jax.experimental.pallas import tpu as pltpu


def _round_up(a, b):
    return (a + b - 1) // b * b


def _mhsa_kernel(x_ref, w_ref, seg_ref, perm_ref, out_ref,
                 *, num_heads, dim_k, dim_v, dk_pad, norm):
    nh = num_heads
    dk = dim_k // nh
    dv = dim_v // nh
    k_off = nh * dk_pad
    v_off = (nh + 1) * dk_pad

    # Fused projection: one lane-dense MXU matmul (bf16 in, f32 accumulate).
    # Output layout: [q_rep(head0) | ... | q_rep(head nh-1) | K | V], each
    # section dk_pad / dk_pad / dv_pad wide -> all later slices are aligned.
    qkv = jnp.dot(x_ref[...], w_ref[...],
                  preferred_element_type=jnp.float32)        # (tb, n_pad) f32

    k_all = qkv[:, k_off:k_off + dk_pad]                      # (tb, dk_pad)
    v_all = qkv[:, v_off:v_off + dim_v]                       # (tb, dim_v)
    seg = seg_ref[...]                                        # (dk_pad, nh) bf16

    out_acc = None
    for h1 in range(nh):
        # q (head h1) pre-replicated across key-head slots by the weight:
        # prod[b, h2*dk+d] = q[b,h1,d] * k[b,h2,d]  (padded lanes are 0*0).
        q_rep = qkv[:, h1 * dk_pad:(h1 + 1) * dk_pad]         # (tb, dk_pad)
        prod = (q_rep * k_all).astype(jnp.bfloat16)           # f32 VPU, bf16 LHS
        scores = jnp.dot(prod, seg,
                         preferred_element_type=jnp.float32) * norm  # (tb, nh)

        # Softmax over the nh key heads (f32; approx reciprocal on the EUP).
        scores = scores - jnp.max(scores, axis=-1, keepdims=True)
        e = jnp.exp(scores)
        p = e * pl.reciprocal(jnp.sum(e, axis=-1, keepdims=True), approx=True)

        # Weighted sum of V heads (nh <= 4 -> single-lane broadcasts are fine).
        att = p[:, 0:1] * v_all[:, 0:dv]
        for h2 in range(1, nh):
            att = att + p[:, h2:h2 + 1] * v_all[:, h2 * dv:(h2 + 1) * dv]

        # Fold transpose(1,2).reshape into a per-head 0/1 permutation matmul,
        # accumulated in f32 (no lane concat of head-major att).
        contrib = jnp.dot(att.astype(jnp.bfloat16), perm_ref[h1],
                          preferred_element_type=jnp.float32)  # (tb, dim_v)
        out_acc = contrib if out_acc is None else out_acc + contrib

    out_ref[...] = out_acc.astype(out_ref.dtype)               # one full store


def multi_head_self_attention(x, wq, wk, wv, num_heads, *, block_batch=1024,
                              vmem_budget_bytes=40 * 1024 * 1024):
    batch, dim_in = x.shape
    dim_k, dim_v = wq.shape[0], wv.shape[0]
    nh = num_heads
    assert dim_k % nh == 0 and dim_v % nh == 0, \
        "dim_k and dim_v must be multiples of num_heads"
    dk, dv = dim_k // nh, dim_v // nh
    norm = 1.0 / math.sqrt(dk)

    # Per-section 128-lane padding so every in-kernel slice is lane-aligned.
    dk_pad = _round_up(dim_k, 128)
    dv_pad = _round_up(dim_v, 128)
    n_pad = (nh + 1) * dk_pad + dv_pad

    # Fused weight [Q_rep | K | V].  Q_rep block h1 holds head h1's Q columns
    # tiled across the nh key-head slots (matching K's column layout), so the
    # projection directly emits the replicated q needed for head-pair scores.
    wq_t, wk_t, wv_t = wq.T, wk.T, wv.T
    sections = []
    for h1 in range(nh):
        blk = jnp.tile(wq_t[:, h1 * dk:(h1 + 1) * dk], (1, nh))   # (dim_in, dim_k)
        sections.append(jnp.pad(blk, ((0, 0), (0, dk_pad - dim_k))))
    sections.append(jnp.pad(wk_t, ((0, 0), (0, dk_pad - dim_k))))
    sections.append(jnp.pad(wv_t, ((0, 0), (0, dv_pad - dim_v))))
    w_fused = jnp.concatenate(sections, axis=1).astype(jnp.bfloat16)

    # Shared 0/1 segment-sum matrix: reduces each dk-wide product segment to
    # one key-head score.  bf16 is exact for 0/1; accumulation stays f32.
    seg_np = np.zeros((dk_pad, nh), np.float32)
    for h2 in range(nh):
        seg_np[h2 * dk:(h2 + 1) * dk, h2] = 1.0
    seg = jnp.asarray(seg_np, dtype=jnp.bfloat16)

    # Per-head 0/1 permutation implementing att.transpose(1,2).reshape(...).
    perm_np = np.zeros((nh, dv, dim_v), np.float32)
    for h1 in range(nh):
        for d in range(dv):
            perm_np[h1, d, d * nh + h1] = 1.0
    perm = jnp.asarray(perm_np, dtype=jnp.bfloat16)

    # --- Batch tiling: multiples of 16, >=2 grid steps when possible (v7x
    # megacore), shrunk to fit a VMEM budget that is safe on v7x (64 MiB). ---
    bpad16 = _round_up(max(batch, 16), 16)
    tb = min(_round_up(block_batch, 16), bpad16)
    half = _round_up((bpad16 + 1) // 2, 16)
    if bpad16 >= 32 and tb > half:
        tb = half

    def _vmem_estimate(tb_):
        est = 2 * tb_ * dim_in * 2            # double-buffered x tiles (bf16)
        est += 2 * tb_ * dim_v * 4            # double-buffered out tiles (f32)
        est += dim_in * n_pad * 2             # resident fused weight (bf16)
        est += dk_pad * nh * 2 + nh * dv * dim_v * 2   # seg + perm (bf16)
        est += tb_ * n_pad * 4                # qkv intermediate (f32)
        est += 2 * tb_ * dk_pad * 4           # prod (+ bf16 copy headroom)
        est += 2 * tb_ * dim_v * 4            # att / perm-matmul accumulators
        return est

    while tb > 16 and _vmem_estimate(tb) > vmem_budget_bytes:
        tb = max(16, _round_up(tb // 2, 16))

    bpad = _round_up(batch, tb)
    x_bf = x.astype(jnp.bfloat16)
    if bpad != batch:
        x_bf = jnp.pad(x_bf, ((0, bpad - batch), (0, 0)))

    kernel = partial(_mhsa_kernel, num_heads=nh, dim_k=dim_k, dim_v=dim_v,
                     dk_pad=dk_pad, norm=norm)

    def _build(single_buffer_consts):
        # Constants have a fixed index_map; double-buffering them only wastes
        # VMEM, so request Buffered(1).  Fallback drops the hint if the JAX
        # version does not support pipeline_mode on BlockSpec.
        const_kw = ({"pipeline_mode": pl.Buffered(1)}
                    if single_buffer_consts else {})
        in_specs = [
            pl.BlockSpec((tb, dim_in), lambda i: (i, 0)),              # x tile
            pl.BlockSpec((dim_in, n_pad), lambda i: (0, 0), **const_kw),
            pl.BlockSpec((dk_pad, nh), lambda i: (0, 0), **const_kw),
            pl.BlockSpec((nh, dv, dim_v), lambda i: (0, 0, 0), **const_kw),
        ]
        return pl.pallas_call(
            kernel,
            out_shape=jax.ShapeDtypeStruct((bpad, dim_v), x.dtype),
            grid=(bpad // tb,),
            in_specs=in_specs,
            out_specs=pl.BlockSpec((tb, dim_v), lambda i: (i, 0)),
            compiler_params=pltpu.CompilerParams(
                dimension_semantics=("parallel",),
                vmem_limit_bytes=48 * 1024 * 1024,   # <= v7x 64 MiB with headroom
            ),
        )

    try:
        out = _build(True)(x_bf, w_fused, seg, perm)
    except Exception:
        # TODO(synk): drop this fallback once pl.Buffered(1) pipeline_mode is
        # universally available.
        out = _build(False)(x_bf, w_fused, seg, perm)

    return out[:batch]


def _reference(x, wq, wk, wv, num_heads):
    batch, dim_in = x.shape
    dim_k, dim_v = wq.shape[0], wv.shape[0]
    nh = num_heads
    dk = dim_k // nh
    dv = dim_v // nh
    q = (x @ wq.T).reshape(batch, nh, dk)
    k = (x @ wk.T).reshape(batch, nh, dk)
    v = (x @ wv.T).reshape(batch, nh, dv)
    dist = jnp.einsum("bhd,bgd->bhg", q, k) * (1.0 / math.sqrt(dk))
    dist = jax.nn.softmax(dist, axis=-1)
    att = jnp.einsum("bhg,bgd->bhd", dist, v)
    return att.transpose(0, 2, 1).reshape(batch, dim_v)


if __name__ == "__main__":
    # Small shapes consistent with the module's forward: x is (batch, dim_in).
    batch, dim_in, dim_k, dim_v, num_heads = 8, 32, 16, 16, 2

    key = jax.random.PRNGKey(0)
    kx, kq, kk, kv = jax.random.split(key, 4)
    bound = 1.0 / math.sqrt(dim_in)  # PyTorch Linear default init scale

    x = jax.random.normal(kx, (batch, dim_in), dtype=jnp.float32)
    wq = jax.random.uniform(kq, (dim_k, dim_in), jnp.float32, -bound, bound)
    wk = jax.random.uniform(kk, (dim_k, dim_in), jnp.float32, -bound, bound)
    wv = jax.random.uniform(kv, (dim_v, dim_in), jnp.float32, -bound, bound)

    out = multi_head_self_attention(x, wq, wk, wv, num_heads)
    out = jax.block_until_ready(out)

    ref = _reference(x, wq, wk, wv, num_heads)
    # bf16 MXU inputs (f32 accumulation) -> relaxed but tight tolerance.
    np.testing.assert_allclose(np.asarray(out), np.asarray(ref),
                               rtol=2e-2, atol=2e-2)

    print("KERNEL_OK")
</pallas_src>

<mosaic_0001>
module attributes {stable_mosaic.version = 11 : i64} {
  func.func @_mhsa_kernel(%arg0: i32, %arg1: memref<16x32xbf16, #tpu.memory_space<vmem>>, %arg2: memref<32x512xbf16, #tpu.memory_space<vmem>>, %arg3: memref<128x2xbf16, #tpu.memory_space<vmem>>, %arg4: memref<2x8x16xbf16, #tpu.memory_space<vmem>>, %arg5: memref<16x16xf32, #tpu.memory_space<vmem>>) attributes {dimension_semantics = [#tpu.dimension_semantics<parallel>], iteration_bounds = array<i64: 1>, scalar_prefetch = 0 : i64, scratch_operands = 0 : i64, tpu.core_type = #tpu.core_type<tc>, window_params = [{transform_indices = @transform_0, window_bounds = array<i64: 16, 32>}, {pipeline_mode = #tpu.pipeline_mode<synchronous>, transform_indices = @transform_1, window_bounds = array<i64: 32, 512>}, {pipeline_mode = #tpu.pipeline_mode<synchronous>, transform_indices = @transform_2, window_bounds = array<i64: 128, 2>}, {pipeline_mode = #tpu.pipeline_mode<synchronous>, transform_indices = @transform_3, window_bounds = array<i64: 2, 8, 16>}, {transform_indices = @transform_4, window_bounds = array<i64: 16, 16>}]} {
    %c0 = arith.constant 0 : index
    %c0_0 = arith.constant 0 : index
    %0 = vector.load %arg1[%c0, %c0_0] : memref<16x32xbf16, #tpu.memory_space<vmem>>, vector<16x32xbf16>
    %c0_1 = arith.constant 0 : index
    %c0_2 = arith.constant 0 : index
    %1 = vector.load %arg2[%c0_1, %c0_2] : memref<32x512xbf16, #tpu.memory_space<vmem>>, vector<32x512xbf16>
    %cst = arith.constant dense<0.000000e+00> : vector<16x512xf32>
    %2 = tpu.matmul %0, %1, %cst {dimension_numbers = #tpu.dot_dimension_numbers<[1], [0], [0], [1], [0, 0, 1, 1], [], []>} : vector<16x32xbf16>, vector<32x512xbf16>, vector<16x512xf32> -> vector<16x512xf32>
    %3 = vector.extract_strided_slice %2 {offsets = [0, 256], sizes = [16, 128], strides = [1, 1]} : vector<16x512xf32> to vector<16x128xf32>
    %4 = vector.extract_strided_slice %2 {offsets = [0, 384], sizes = [16, 16], strides = [1, 1]} : vector<16x512xf32> to vector<16x16xf32>
    %c0_3 = arith.constant 0 : index
    %c0_4 = arith.constant 0 : index
    %5 = vector.load %arg3[%c0_3, %c0_4] : memref<128x2xbf16, #tpu.memory_space<vmem>>, vector<128x2xbf16>
    %6 = vector.extract_strided_slice %2 {offsets = [0, 0], sizes = [16, 128], strides = [1, 1]} : vector<16x512xf32> to vector<16x128xf32>
    %7 = arith.mulf %6, %3 : vector<16x128xf32>
    %8 = arith.truncf %7 : vector<16x128xf32> to vector<16x128xbf16>
    %cst_5 = arith.constant dense<0.000000e+00> : vector<16x2xf32>
    %9 = tpu.matmul %8, %5, %cst_5 {dimension_numbers = #tpu.dot_dimension_numbers<[1], [0], [0], [1], [0, 0, 1, 1], [], []>} : vector<16x128xbf16>, vector<128x2xbf16>, vector<16x2xf32> -> vector<16x2xf32>
    %cst_6 = arith.constant 0.353553385 : f32
    %10 = vector.broadcast %cst_6 : f32 to vector<16x2xf32>
    %11 = arith.mulf %9, %10 : vector<16x2xf32>
    %cst_7 = arith.constant dense<0xFF800000> : vector<16xf32>
    %12 = vector.multi_reduction <maximumf>, %11, %cst_7 [1] : vector<16x2xf32> to vector<16xf32>
    %13 = vector.shape_cast %12 : vector<16xf32> to vector<16x1xf32>
    %14 = vector.broadcast %13 : vector<16x1xf32> to vector<16x2xf32>
    %15 = arith.subf %11, %14 : vector<16x2xf32>
    %16 = math.exp %15 : vector<16x2xf32>
    %cst_8 = arith.constant dense<0.000000e+00> : vector<16xf32>
    %17 = vector.multi_reduction <add>, %16, %cst_8 [1] : vector<16x2xf32> to vector<16xf32>
    %18 = vector.shape_cast %17 : vector<16xf32> to vector<16x1xf32>
    %19 = tpu.reciprocal %18 {approx = true} : vector<16x1xf32> -> vector<16x1xf32>
    %20 = vector.broadcast %19 : vector<16x1xf32> to vector<16x2xf32>
    %21 = arith.mulf %16, %20 : vector<16x2xf32>
    %22 = vector.extract_strided_slice %21 {offsets = [0, 0], sizes = [16, 1], strides = [1, 1]} : vector<16x2xf32> to vector<16x1xf32>
    %23 = vector.extract_strided_slice %4 {offsets = [0, 0], sizes = [16, 8], strides = [1, 1]} : vector<16x16xf32> to vector<16x8xf32>
    %24 = vector.broadcast %22 : vector<16x1xf32> to vector<16x8xf32>
    %25 = arith.mulf %24, %23 : vector<16x8xf32>
    %26 = vector.extract_strided_slice %21 {offsets = [0, 1], sizes = [16, 1], strides = [1, 1]} : vector<16x2xf32> to vector<16x1xf32>
    %27 = vector.extract_strided_slice %4 {offsets = [0, 8], sizes = [16, 8], strides = [1, 1]} : vector<16x16xf32> to vector<16x8xf32>
    %28 = vector.broadcast %26 : vector<16x1xf32> to vector<16x8xf32>
    %29 = arith.mulf %28, %27 : vector<16x8xf32>
    %30 = arith.addf %25, %29 : vector<16x8xf32>
    %31 = arith.truncf %30 : vector<16x8xf32> to vector<16x8xbf16>
    %c0_9 = arith.constant 0 : index
    %c0_10 = arith.constant 0 : index
    %c0_11 = arith.constant 0 : index
    %32 = vector.load %arg4[%c0_9, %c0_10, %c0_11] : memref<2x8x16xbf16, #tpu.memory_space<vmem>>, vector<1x8x16xbf16>
    %33 = vector.shape_cast %32 : vector<1x8x16xbf16> to vector<8x16xbf16>
    %cst_12 = arith.constant dense<0.000000e+00> : vector<16x16xf32>
    %34 = tpu.matmul %31, %33, %cst_12 {dimension_numbers = #tpu.dot_dimension_numbers<[1], [0], [0], [1], [0, 0, 1, 1], [], []>} : vector<16x8xbf16>, vector<8x16xbf16>, vector<16x16xf32> -> vector<16x16xf32>
    %35 = vector.extract_strided_slice %2 {offsets = [0, 128], sizes = [16, 128], strides = [1, 1]} : vector<16x512xf32> to vector<16x128xf32>
    %36 = arith.mulf %35, %3 : vector<16x128xf32>
    %37 = arith.truncf %36 : vector<16x128xf32> to vector<16x128xbf16>
    %cst_13 = arith.constant dense<0.000000e+00> : vector<16x2xf32>
    %38 = tpu.matmul %37, %5, %cst_13 {dimension_numbers = #tpu.dot_dimension_numbers<[1], [0], [0], [1], [0, 0, 1, 1], [], []>} : vector<16x128xbf16>, vector<128x2xbf16>, vector<16x2xf32> -> vector<16x2xf32>
    %cst_14 = arith.constant 0.353553385 : f32
    %39 = vector.broadcast %cst_14 : f32 to vector<16x2xf32>
    %40 = arith.mulf %38, %39 : vector<16x2xf32>
    %cst_15 = arith.constant dense<0xFF800000> : vector<16xf32>
    %41 = vector.multi_reduction <maximumf>, %40, %cst_15 [1] : vector<16x2xf32> to vector<16xf32>
    %42 = vector.shape_cast %41 : vector<16xf32> to vector<16x1xf32>
    %43 = vector.broadcast %42 : vector<16x1xf32> to vector<16x2xf32>
    %44 = arith.subf %40, %43 : vector<16x2xf32>
    %45 = math.exp %44 : vector<16x2xf32>
    %cst_16 = arith.constant dense<0.000000e+00> : vector<16xf32>
    %46 = vector.multi_reduction <add>, %45, %cst_16 [1] : vector<16x2xf32> to vector<16xf32>
    %47 = vector.shape_cast %46 : vector<16xf32> to vector<16x1xf32>
    %48 = tpu.reciprocal %47 {approx = true} : vector<16x1xf32> -> vector<16x1xf32>
    %49 = vector.broadcast %48 : vector<16x1xf32> to vector<16x2xf32>
    %50 = arith.mulf %45, %49 : vector<16x2xf32>
    %51 = vector.extract_strided_slice %50 {offsets = [0, 0], sizes = [16, 1], strides = [1, 1]} : vector<16x2xf32> to vector<16x1xf32>
    %52 = vector.extract_strided_slice %4 {offsets = [0, 0], sizes = [16, 8], strides = [1, 1]} : vector<16x16xf32> to vector<16x8xf32>
    %53 = vector.broadcast %51 : vector<16x1xf32> to vector<16x8xf32>
    %54 = arith.mulf %53, %52 : vector<16x8xf32>
    %55 = vector.extract_strided_slice %50 {offsets = [0, 1], sizes = [16, 1], strides = [1, 1]} : vector<16x2xf32> to vector<16x1xf32>
    %56 = vector.extract_strided_slice %4 {offsets = [0, 8], sizes = [16, 8], strides = [1, 1]} : vector<16x16xf32> to vector<16x8xf32>
    %57 = vector.broadcast %55 : vector<16x1xf32> to vector<16x8xf32>
    %58 = arith.mulf %57, %56 : vector<16x8xf32>
    %59 = arith.addf %54, %58 : vector<16x8xf32>
    %60 = arith.truncf %59 : vector<16x8xf32> to vector<16x8xbf16>
    %c1 = arith.constant 1 : index
    %c0_17 = arith.constant 0 : index
    %c0_18 = arith.constant 0 : index
    %61 = vector.load %arg4[%c1, %c0_17, %c0_18] : memref<2x8x16xbf16, #tpu.memory_space<vmem>>, vector<1x8x16xbf16>
    %62 = vector.shape_cast %61 : vector<1x8x16xbf16> to vector<8x16xbf16>
    %cst_19 = arith.constant dense<0.000000e+00> : vector<16x16xf32>
    %63 = tpu.matmul %60, %62, %cst_19 {dimension_numbers = #tpu.dot_dimension_numbers<[1], [0], [0], [1], [0, 0, 1, 1], [], []>} : vector<16x8xbf16>, vector<8x16xbf16>, vector<16x16xf32> -> vector<16x16xf32>
    %64 = arith.addf %34, %63 : vector<16x16xf32>
    %c0_20 = arith.constant 0 : index
    %c0_21 = arith.constant 0 : index
    %65 = vector.load %arg5[%c0_20, %c0_21] : memref<16x16xf32, #tpu.memory_space<vmem>>, vector<16x16xf32>
    tpu.vector_store %arg5[%c0_20, %c0_21], %64 {strides = array<i32>} : memref<16x16xf32, #tpu.memory_space<vmem>>, vector<16x16xf32>,
    return
  }
  func.func @transform_0(%arg0: i32) -> (i32, i32) {
    %c0_i32 = arith.constant 0 : i32
    %c0_i32_0 = arith.constant 0 : i32
    return %arg0, %c0_i32 : i32, i32
  }
  func.func @transform_1(%arg0: i32) -> (i32, i32) {
    %c0_i32 = arith.constant 0 : i32
    %c0_i32_0 = arith.constant 0 : i32
    %c0_i32_1 = arith.constant 0 : i32
    return %c0_i32, %c0_i32_0 : i32, i32
  }
  func.func @transform_2(%arg0: i32) -> (i32, i32) {
    %c0_i32 = arith.constant 0 : i32
    %c0_i32_0 = arith.constant 0 : i32
    %c0_i32_1 = arith.constant 0 : i32
    return %c0_i32, %c0_i32_0 : i32, i32
  }
  func.func @transform_3(%arg0: i32) -> (i32, i32, i32) {
    %c0_i32 = arith.constant 0 : i32
    %c0_i32_0 = arith.constant 0 : i32
    %c0_i32_1 = arith.constant 0 : i32
    %c0_i32_2 = arith.constant 0 : i32
    return %c0_i32, %c0_i32_0, %c0_i32_1 : i32, i32, i32
  }
  func.func @transform_4(%arg0: i32) -> (i32, i32) {
    %c0_i32 = arith.constant 0 : i32
    %c0_i32_0 = arith.constant 0 : i32
    return %arg0, %c0_i32 : i32, i32
  }
}

module attributes {stable_mosaic.version = 11 : i64} {
  func.func @_mhsa_kernel(%arg0: i32, %arg1: memref<16x32xbf16, #tpu.memory_space<vmem>>, %arg2: memref<32x512xbf16, #tpu.memory_space<vmem>>, %arg3: memref<128x2xbf16, #tpu.memory_space<vmem>>, %arg4: memref<2x8x16xbf16, #tpu.memory_space<vmem>>, %arg5: memref<16x16xf32, #tpu.memory_space<vmem>>) attributes {dimension_semantics = [#tpu.dimension_semantics<parallel>], iteration_bounds = array<i64: 1>, scalar_prefetch = 0 : i64, scratch_operands = 0 : i64, tpu.core_type = #tpu.core_type<tc>, window_params = [{transform_indices = @transform_0, window_bounds = array<i64: 16, 32>}, {pipeline_mode = #tpu.pipeline_mode<synchronous>, transform_indices = @transform_1, window_bounds = array<i64: 32, 512>}, {pipeline_mode = #tpu.pipeline_mode<synchronous>, transform_indices = @transform_2, window_bounds = array<i64: 128, 2>}, {pipeline_mode = #tpu.pipeline_mode<synchronous>, transform_indices = @transform_3, window_bounds = array<i64: 2, 8, 16>}, {transform_indices = @transform_4, window_bounds = array<i64: 16, 16>}]} {
    %c0 = arith.constant 0 : index
    %c0_0 = arith.constant 0 : index
    %0 = vector.load %arg1[%c0, %c0_0] : memref<16x32xbf16, #tpu.memory_space<vmem>>, vector<16x32xbf16>
    %c0_1 = arith.constant 0 : index
    %c0_2 = arith.constant 0 : index
    %1 = vector.load %arg2[%c0_1, %c0_2] : memref<32x512xbf16, #tpu.memory_space<vmem>>, vector<32x512xbf16>
    %cst = arith.constant dense<0.000000e+00> : vector<16x512xf32>
    %2 = tpu.matmul %0, %1, %cst {dimension_numbers = #tpu.dot_dimension_numbers<[1], [0], [0], [1], [0, 0, 1, 1], [], []>} : vector<16x32xbf16>, vector<32x512xbf16>, vector<16x512xf32> -> vector<16x512xf32>
    %3 = vector.extract_strided_slice %2 {offsets = [0, 256], sizes = [16, 128], strides = [1, 1]} : vector<16x512xf32> to vector<16x128xf32>
    %4 = vector.extract_strided_slice %2 {offsets = [0, 384], sizes = [16, 16], strides = [1, 1]} : vector<16x512xf32> to vector<16x16xf32>
    %c0_3 = arith.constant 0 : index
    %c0_4 = arith.constant 0 : index
    %5 = vector.load %arg3[%c0_3, %c0_4] : memref<128x2xbf16, #tpu.memory_space<vmem>>, vector<128x2xbf16>
    %6 = vector.extract_strided_slice %2 {offsets = [0, 0], sizes = [16, 128], strides = [1, 1]} : vector<16x512xf32> to vector<16x128xf32>
    %7 = arith.mulf %6, %3 : vector<16x128xf32>
    %8 = arith.truncf %7 : vector<16x128xf32> to vector<16x128xbf16>
    %cst_5 = arith.constant dense<0.000000e+00> : vector<16x2xf32>
    %9 = tpu.matmul %8, %5, %cst_5 {dimension_numbers = #tpu.dot_dimension_numbers<[1], [0], [0], [1], [0, 0, 1, 1], [], []>} : vector<16x128xbf16>, vector<128x2xbf16>, vector<16x2xf32> -> vector<16x2xf32>
    %cst_6 = arith.constant 0.353553385 : f32
    %10 = vector.broadcast %cst_6 : f32 to vector<16x2xf32>
    %11 = arith.mulf %9, %10 : vector<16x2xf32>
    %cst_7 = arith.constant dense<0xFF800000> : vector<16xf32>
    %12 = vector.multi_reduction <maximumf>, %11, %cst_7 [1] : vector<16x2xf32> to vector<16xf32>
    %13 = vector.shape_cast %12 : vector<16xf32> to vector<16x1xf32>
    %14 = vector.broadcast %13 : vector<16x1xf32> to vector<16x2xf32>
    %15 = arith.subf %11, %14 : vector<16x2xf32>
    %16 = math.exp %15 : vector<16x2xf32>
    %cst_8 = arith.constant dense<0.000000e+00> : vector<16xf32>
    %17 = vector.multi_reduction <add>, %16, %cst_8 [1] : vector<16x2xf32> to vector<16xf32>
    %18 = vector.shape_cast %17 : vector<16xf32> to vector<16x1xf32>
    %19 = tpu.reciprocal %18 {approx = true} : vector<16x1xf32> -> vector<16x1xf32>
    %20 = vector.broadcast %19 : vector<16x1xf32> to vector<16x2xf32>
    %21 = arith.mulf %16, %20 : vector<16x2xf32>
    %22 = vector.extract_strided_slice %21 {offsets = [0, 0], sizes = [16, 1], strides = [1, 1]} : vector<16x2xf32> to vector<16x1xf32>
    %23 = vector.extract_strided_slice %4 {offsets = [0, 0], sizes = [16, 8], strides = [1, 1]} : vector<16x16xf32> to vector<16x8xf32>
    %24 = vector.broadcast %22 : vector<16x1xf32> to vector<16x8xf32>
    %25 = arith.mulf %24, %23 : vector<16x8xf32>
    %26 = vector.extract_strided_slice %21 {offsets = [0, 1], sizes = [16, 1], strides = [1, 1]} : vector<16x2xf32> to vector<16x1xf32>
    %27 = vector.extract_strided_slice %4 {offsets = [0, 8], sizes = [16, 8], strides = [1, 1]} : vector<16x16xf32> to vector<16x8xf32>
    %28 = vector.broadcast %26 : vector<16x1xf32> to vector<16x8xf32>
    %29 = arith.mulf %28, %27 : vector<16x8xf32>
    %30 = arith.addf %25, %29 : vector<16x8xf32>
    %31 = arith.truncf %30 : vector<16x8xf32> to vector<16x8xbf16>
    %c0_9 = arith.constant 0 : index
    %c0_10 = arith.constant 0 : index
    %c0_11 = arith.constant 0 : index
    %32 = vector.load %arg4[%c0_9, %c0_10, %c0_11] : memref<2x8x16xbf16, #tpu.memory_space<vmem>>, vector<1x8x16xbf16>
    %33 = vector.shape_cast %32 : vector<1x8x16xbf16> to vector<8x16xbf16>
    %cst_12 = arith.constant dense<0.000000e+00> : vector<16x16xf32>
    %34 = tpu.matmul %31, %33, %cst_12 {dimension_numbers = #tpu.dot_dimension_numbers<[1], [0], [0], [1], [0, 0, 1, 1], [], []>} : vector<16x8xbf16>, vector<8x16xbf16>, vector<16x16xf32> -> vector<16x16xf32>
    %35 = vector.extract_strided_slice %2 {offsets = [0, 128], sizes = [16, 128], strides = [1, 1]} : vector<16x512xf32> to vector<16x128xf32>
    %36 = arith.mulf %35, %3 : vector<16x128xf32>
    %37 = arith.truncf %36 : vector<16x128xf32> to vector<16x128xbf16>
    %cst_13 = arith.constant dense<0.000000e+00> : vector<16x2xf32>
    %38 = tpu.matmul %37, %5, %cst_13 {dimension_numbers = #tpu.dot_dimension_numbers<[1], [0], [0], [1], [0, 0, 1, 1], [], []>} : vector<16x128xbf16>, vector<128x2xbf16>, vector<16x2xf32> -> vector<16x2xf32>
    %cst_14 = arith.constant 0.353553385 : f32
    %39 = vector.broadcast %cst_14 : f32 to vector<16x2xf32>
    %40 = arith.mulf %38, %39 : vector<16x2xf32>
    %cst_15 = arith.constant dense<0xFF800000> : vector<16xf32>
    %41 = vector.multi_reduction <maximumf>, %40, %cst_15 [1] : vector<16x2xf32> to vector<16xf32>
    %42 = vector.shape_cast %41 : vector<16xf32> to vector<16x1xf32>
    %43 = vector.broadcast %42 : vector<16x1xf32> to vector<16x2xf32>
    %44 = arith.subf %40, %43 : vector<16x2xf32>
    %45 = math.exp %44 : vector<16x2xf32>
    %cst_16 = arith.constant dense<0.000000e+00> : vector<16xf32>
    %46 = vector.multi_reduction <add>, %45, %cst_16 [1] : vector<16x2xf32> to vector<16xf32>
    %47 = vector.shape_cast %46 : vector<16xf32> to vector<16x1xf32>
    %48 = tpu.reciprocal %47 {approx = true} : vector<16x1xf32> -> vector<16x1xf32>
    %49 = vector.broadcast %48 : vector<16x1xf32> to vector<16x2xf32>
    %50 = arith.mulf %45, %49 : vector<16x2xf32>
    %51 = vector.extract_strided_slice %50 {offsets = [0, 0], sizes = [16, 1], strides = [1, 1]} : vector<16x2xf32> to vector<16x1xf32>
    %52 = vector.extract_strided_slice %4 {offsets = [0, 0], sizes = [16, 8], strides = [1, 1]} : vector<16x16xf32> to vector<16x8xf32>
    %53 = vector.broadcast %51 : vector<16x1xf32> to vector<16x8xf32>
    %54 = arith.mulf %53, %52 : vector<16x8xf32>
    %55 = vector.extract_strided_slice %50 {offsets = [0, 1], sizes = [16, 1], strides = [1, 1]} : vector<16x2xf32> to vector<16x1xf32>
    %56 = vector.extract_strided_slice %4 {offsets = [0, 8], sizes = [16, 8], strides = [1, 1]} : vector<16x16xf32> to vector<16x8xf32>
    %57 = vector.broadcast %55 : vector<16x1xf32> to vector<16x8xf32>
    %58 = arith.mulf %57, %56 : vector<16x8xf32>
    %59 = arith.addf %54, %58 : vector<16x8xf32>
    %60 = arith.truncf %59 : vector<16x8xf32> to vector<16x8xbf16>
    %c1 = arith.constant 1 : index
    %c0_17 = arith.constant 0 : index
    %c0_18 = arith.constant 0 : index
    %61 = vector.load %arg4[%c1, %c0_17, %c0_18] : memref<2x8x16xbf16, #tpu.memory_space<vmem>>, vector<1x8x16xbf16>
    %62 = vector.shape_cast %61 : vector<1x8x16xbf16> to vector<8x16xbf16>
    %cst_19 = arith.constant dense<0.000000e+00> : vector<16x16xf32>
    %63 = tpu.matmul %60, %62, %cst_19 {dimension_numbers = #tpu.dot_dimension_numbers<[1], [0], [0], [1], [0, 0, 1, 1], [], []>} : vector<16x8xbf16>, vector<8x16xbf16>, vector<16x16xf32> -> vector<16x16xf32>
    %64 = arith.addf %34, %63 : vector<16x16xf32>
    %c0_20 = arith.constant 0 : index
    %c0_21 = arith.constant 0 : index
    %65 = vector.load %arg5[%c0_20, %c0_21] : memref<16x16xf32, #tpu.memory_space<vmem>>, vector<16x16xf32>
    tpu.vector_store %arg5[%c0_20, %c0_21], %64 {strides = array<i32>} : memref<16x16xf32, #tpu.memory_space<vmem>>, vector<16x16xf32>,
    return
  }
  func.func @transform_0(%arg0: i32) -> (i32, i32) {
    %c0_i32 = arith.constant 0 : i32
    %c0_i32_0 = arith.constant 0 : i32
    return %arg0, %c0_i32 : i32, i32
  }
  func.func @transform_1(%arg0: i32) -> (i32, i32) {
    %c0_i32 = arith.constant 0 : i32
    %c0_i32_0 = arith.constant 0 : i32
    %c0_i32_1 = arith.constant 0 : i32
    return %c0_i32, %c0_i32_0 : i32, i32
  }
  func.func @transform_2(%arg0: i32) -> (i32, i32) {
    %c0_i32 = arith.constant 0 : i32
    %c0_i32_0 = arith.constant 0 : i32
    %c0_i32_1 = arith.constant 0 : i32
    return %c0_i32, %c0_i32_0 : i32, i32
  }
  func.func @transform_3(%arg0: i32) -> (i32, i32, i32) {
    %c0_i32 = arith.constant 0 : i32
    %c0_i32_0 = arith.constant 0 : i32
    %c0_i32_1 = arith.constant 0 : i32
    %c0_i32_2 = arith.constant 0 : i32
    return %c0_i32, %c0_i32_0, %c0_i32_1 : i32, i32, i32
  }
  func.func @transform_4(%arg0: i32) -> (i32, i32) {
    %c0_i32 = arith.constant 0 : i32
    %c0_i32_0 = arith.constant 0 : i32
    return %arg0, %c0_i32 : i32, i32
  }
}

</mosaic_0001>

<bundles_post_ra>
// kernel: tpu_custom_call.1
= control target key start
LH: loop header
LB: loop body
LE: loop exit
PB: predicated region body
PF: predicated region fallthrough
CT: control target
= control target key end

     0   :  { %9 = vsyncpa [#allocation3], 0  ;;  %s933_s0 = inlined_call_operand.hbm [shape: bf16[16,32], index: 0, kind: input, shape index: {}]   ;;  %s934_s1 = inlined_call_operand.vmem [shape: bf16[32,512], index: 1, kind: input, shape index: {}]   ;;  %s935_s2 = inlined_call_operand.vmem [shape: bf16[128,2], index: 2, kind: input, shape index: {}]   ;;  %s936_s3 = inlined_call_operand.vmem [shape: bf16[2,8,16], index: 3, kind: input, shape index: {}]   ;;  %s937_s4 = inlined_call_operand.hbm [shape: f32[16,16], index: 4, kind: output, shape index: {}]  }
   0x1   :  { %10 = vsyncpa [#allocation4], 0  ;;  %s765_s15 = smov [#allocation2]   ;;  %s717_s19 = scalar_lea.hbm %s933_s0, 128 }
   0x2   :  { %s16_s16 = sshll.u32 %s765_s15, 4  ;;  %p718_p0 = scmp.ne.s32.totalorder %s933_s0, %s717_s19  ;;  %s17_s16 = int_to_ptr.vmem [resolvable:$true] %s16_s16 }
   0x3   :  { %p721_p1 = scmp.lt.u32.totalorder %s717_s19, %s933_s0 }
   0x5   :  { %p723_p2 = pnand %p721_p1, %p718_p0 }
   0x7   :  { %726 = shalt.err (!%p723_p2)
}
   0x8   :  { %s727_s24 = scalar_lea.vmem %s17_s16, 128  ;;  %p732_p4 = scmp.lt.s32.totalorder %s17_s16, %s17_s16 }
   0x9   :  { %p728_p3 = scmp.ne.s32.totalorder %s17_s16, %s727_s24  ;;  %p733_p5 = scmp.lt.s32.totalorder %s727_s24, %s727_s24 }
   0xb   :  { %p734_p6 = por %p733_p5, %p732_p4 }
   0xd   :  { %p735_p7 = pnand %p734_p6, %p728_p3 }
   0xf   :  { %738 = shalt.err (!%p735_p7)
}
  0x10   :  { %s766_s25 = smov 64   ;;  %s767_s26 = smov 4  }
  0x11   :  { %22 = dma.hbm_to_vmem [thread:$0]  %s933_s0, 128, %s17_s16, [#allocation3], %s766_s25, %s766_s25, %s767_s26  }
  0x12   :  { %761 = dma.done.wait [#allocation3], 128  }
  0x13   :  { %762 = vsyncadd [#allocation3], 4294967168  ;;  %v768_v0 = vmov 0   ;;  %v769_v1 = vmov 0.0   ;;  %v680_v2 = vld [vmem:[%s934_s1 + $0x4] ss:$16 sps:$4 sm:$0xff]  }
  0x14   :  { %124 = vmatprep.mubr.bf16.mxu1 %v768_v0  ;;  %608 = vmatprep.subr.bf16.mxu0 %v769_v1  ;;  %v682_v3 = vld [vmem:[%s934_s1] ss:$16 sps:$4 sm:$0xff]   ;;  %v683_v4 = vld [vmem:[%s934_s1 + $0x24] ss:$16 sps:$4 sm:$0xff]   ;;  %v689_v6 = vld [vmem:[%s934_s1 + $0xc] ss:$16 sps:$4 sm:$0xff]  }
  0x15   :  { %92 = vmatprep.subr.bf16.mxu1 %v680_v2  ;;  %v685_v5 = vld [vmem:[%s934_s1 + $0x20] ss:$16 sps:$4 sm:$0xff]   ;;  %v687_v8 = vld [vmem:[%s934_s1 + $0x8] ss:$16 sps:$4 sm:$0xff]   ;;  %vm88_vm0 = vcmask 261120   ;;  %vm770_vm1 = vmmov 0  }
  0x16   :  { %93 = vmatpush1.bf16.msra.mxu1 %v682_v3  ;;  %v686_v7 = vld [vmem:[#allocation2] sm:$0xff]   ;;  %v692_v10 = vld [vmem:[%s934_s1 + $0x2c] ss:$16 sps:$4 sm:$0xff]   ;;  %v690_v12 = vld [vmem:[%s934_s1 + $0x28] ss:$16 sps:$4 sm:$0xff]   ;;  %624 = vmatprep.mubr.msk.bf16.mxu0 %vm770_vm1, %v769_v1  ;;  %vm288_vm2 = vcmask 15360  }
  0x17   :  { %94 = vmatprep.subr.bf16.mxu1 %v683_v4  ;;  %v693_v9 = vld [vmem:[%s935_s2] sm:$0xff]   ;;  %v694_v11 = vld [vmem:[%s935_s2 + $0x8] sm:$0xff]   ;;  %v695_v13 = vld [vmem:[%s935_s2 + $0x10] sm:$0xff]   ;;  %vm452_vm3 = vcmask 1043456   ;;  %s772_s8 = smov 120   ;;  %vm448_vm4 = vcmask 64512  }
  0x18   :  { %609 = vmatpush3.bf16.msra.mxu0 %v693_v9  ;;  %v696_v14 = vld [vmem:[%s935_s2 + $0x18] sm:$0xff]   ;;  %v697_v15 = vld [vmem:[%s935_s2 + $0x20] sm:$0xff]   ;;  %v698_v16 = vld [vmem:[%s935_s2 + $0x28] sm:$0xff]   ;;  %vm544_vm5 = vcmask 130048  }
  0x19   :  { %610 = vmatprep.subr.bf16.mxu0 %v769_v1  ;;  %v699_v17 = vld [vmem:[%s935_s2 + $0x30] sm:$0xff]   ;;  %v700_v18 = vld [vmem:[%s935_s2 + $0x38] sm:$0xff]  }
  0x1a   :  { %95 = vmatpush1.bf16.msra.mxu1 %v685_v5 }
  0x1b   :  { %135 = vmatprep.subr.bf16.mxu1 %v689_v6 }
  0x1c   :  { %611 = vmatpush3.bf16.msra.mxu0 %v694_v11 }
  0x1d   :  { %573 = vmatmul.mubr.msk.bf16.vlgmr.msra.gmra.mrb[0].mxu1 %vm88_vm0, %v686_v7  ;;  %612 = vmatprep.subr.bf16.mxu0 %v769_v1 }
  0x1e   :  { %136 = vmatpush1.bf16.msra.mxu1 %v687_v8  ;;  %167 = vmatprep.mubr.bf16.mxu1 %v768_v0 }
  0x1f   :  { %137 = vmatprep.subr.bf16.mxu1 %v692_v10 }
  0x20   :  { %613 = vmatpush3.bf16.msra.mxu0 %v695_v13 }
  0x21   :  { %614 = vmatprep.subr.bf16.mxu0 %v769_v1 }
  0x22   :  { %138 = vmatpush1.bf16.msra.mxu1 %v690_v12 }
  0x23   :  { %628 = vmatprep.subr.bf16.mxu1 %v769_v1 }
  0x24   :  { %615 = vmatpush3.bf16.msra.mxu0 %v696_v14 }
  0x25   :  { %574 = vmatmul.mubr.msk.bf16.vlgmr.msra.gmra.mrb[4].mxu1 %vm88_vm0, %v686_v7  ;;  %616 = vmatprep.subr.bf16.mxu0 %v769_v1  ;;  %v771_v7 = vmov 1  }
  0x26   :  { %629 = vmatpush3.bf16.msra.mxu1 %v693_v9  ;;  %644 = vmatprep.mubr.msk.bf16.mxu1 %vm770_vm1, %v769_v1 }
  0x27   :  { %630 = vmatprep.subr.bf16.mxu1 %v769_v1  ;;  %675 = vset.pattern.permute.xlu0 %v771_v7 }
  0x28   :  { %617 = vmatpush3.bf16.msra.mxu0 %v697_v15  ;;  %676 = vset.pattern.permute.xlu1 %v771_v7 }
  0x29   :  { %618 = vmatprep.subr.bf16.mxu0 %v769_v1 }
  0x2a   :  { %631 = vmatpush3.bf16.msra.mxu1 %v694_v11 }
  0x2b   :  { %632 = vmatprep.subr.bf16.mxu1 %v769_v1 }
  0x2c   :  { %619 = vmatpush3.bf16.msra.mxu0 %v698_v16 }
  0x2d   :  { %620 = vmatprep.subr.bf16.mxu0 %v769_v1 }
  0x2e   :  { %633 = vmatpush3.bf16.msra.mxu1 %v695_v13 }
  0x2f   :  { %634 = vmatprep.subr.bf16.mxu1 %v769_v1 }
  0x30   :  { %621 = vmatpush3.bf16.msra.mxu0 %v699_v17 }
  0x31   :  { %622 = vmatprep.subr.bf16.mxu0 %v769_v1 }
  0x32   :  { %635 = vmatpush3.bf16.msra.mxu1 %v696_v14 }
  0x33   :  { %636 = vmatprep.subr.bf16.mxu1 %v769_v1 }
  0x34   :  { %623 = vmatpush3.bf16.msra.mxu0 %v700_v18 }
  0x35   :  { %648 = vmatprep.subr.bf16.mxu0 %v769_v1 }
  0x36   :  { %637 = vmatpush3.bf16.msra.mxu1 %v697_v15 }
  0x37   :  { %638 = vmatprep.subr.bf16.mxu1 %v769_v1 }
  0x3a   :  { %639 = vmatpush3.bf16.msra.mxu1 %v698_v16 }
  0x3b   :  { %640 = vmatprep.subr.bf16.mxu1 %v769_v1 }
  0x3e   :  { %641 = vmatpush3.bf16.msra.mxu1 %v699_v17 }
  0x3f   :  { %642 = vmatprep.subr.bf16.mxu1 %v769_v1 }
  0x42   :  { %643 = vmatpush3.bf16.msra.mxu1 %v700_v18 }
  0xf0   :  { %v126_v19 = vpop.f32.mrb[0].mxu1 }
  0xf1   :  { %v128_v20 = vpop.f32.mrb[1].mxu1 }
  0xf2   :  { %v130_v21 = vpop.f32.mrb[2].mxu1 }
  0xf3   :  { %v132_v22 = vpop.f32.mrb[3].mxu1 }
  0xf8   :  { %v169_v23 = vpop.f32.mrb[4].mxu1 }
  0xf9   :  { %v194_v24 = vmul.f32 %v169_v23, %v126_v19  ;;  %v345_v25 = vmul.f32 %v169_v23, %v128_v20  ;;  %v886_v26 = vpop.f32.mrb[5].mxu1  ;;  %v583_v20 = vld [vmem:[%s936_s3 + $0x4] sm:$0xf] }
  0xfa   :  { %v173_v27 = vpop.f32.mrb[6].mxu1 }
  0xfb   :  { %v195_v28 = vmul.f32 %v173_v27, %v130_v21  ;;  %v346_v29 = vmul.f32 %v173_v27, %v132_v22  ;;  %v888_v30 = vpop.f32.mrb[7].mxu1  ;;  %v454_v21 = vsel %vm452_vm3, %v583_v20, 0 }
  0xfd   :  { %v196_v31 = vpack.c.bf16 %v195_v28, %v194_v24  ;;  %v347_v32 = vpack.c.bf16 %v346_v29, %v345_v25 }
  0xff   :  { %625 = vmatmul.mubr.bf16.vlgmr.msra.gmra.mrb[0].mxu0 %v196_v31  ;;  %645 = vmatmul.mubr.bf16.vlgmr.msra.gmra.mrb[8].mxu1 %v347_v32 }
 0x100   :  { %650 = vmatprep.mubr.msk.bf16.mxu0 %vm770_vm1, %v769_v1  ;;  %649 = vmatpush3.bf16.msra.mxu0 %v454_v21 }
 0x101   :  { %654 = vmatprep.subr.bf16.mxu0 %v769_v1 }
 0x1d2   :  { %v279_v33 = vpop.f32.mrb[0].mxu0  ;;  %v382_v34 = vpop.f32.mrb[8].mxu1 }
 0x1d3   :  { %v286_v35 = vmul.f32 0.35355338, %v279_v33  ;;  %v389_v36 = vmul.f32 0.35355338, %v382_v34  ;;  %v626_v37 = vpop.f32.mrb[1].mxu0  ;;  %v646_v38 = vpop.f32.mrb[9].mxu1 }
 0x1d4   :  { %v282_v39 = vpop.f32.mrb[2].mxu0  ;;  %v385_v40 = vpop.f32.mrb[10].mxu1  ;;  %v344_v37 = vld [vmem:[%s936_s3] sm:$0xf]  ;;  %s773_s3 = smov [#allocation5]  }
 0x1d5   :  { %v627_v41 = vpop.f32.mrb[3].mxu0  ;;  %v647_v42 = vpop.f32.mrb[11].mxu1  ;;  %v287_v43 = vmul.f32 0.35355338, %v282_v39  ;;  %v390_v44 = vmul.f32 0.35355338, %v385_v40 }
 0x1d6   :  { %v289_v45 = vsel %vm288_vm2, %v286_v35, -inf  ;;  %v391_v46 = vsel %vm288_vm2, %v389_v36, -inf  ;;  %v501_v41 = vsel %vm452_vm3, %v344_v37, 0  ;;  %s552_s10 = sshll.u32 %s773_s3, 4  ;;  %s553_s10 = int_to_ptr.vmem [resolvable:$true] %s552_s10 }
 0x1d7   :  { %290 = vmax.xlane.f32.xlu1 %v289_v45  ;;  %392 = vmax.xlane.f32.xlu0 %v391_v46  ;;  %v292_v47 = vsel %vm288_vm2, %v287_v43, -inf  ;;  %v394_v48 = vsel %vm288_vm2, %v390_v44, -inf  ;;  %s739_s11 = scalar_lea.vmem %s553_s10, 256  ;;  %p744_p9 = scmp.lt.s32.totalorder %s553_s10, %s553_s10 }
 0x1d8   :  { %p740_p8 = scmp.ne.s32.totalorder %s553_s10, %s739_s11  ;;  %p745_p10 = scmp.lt.s32.totalorder %s739_s11, %s739_s11 }
 0x1da   :  { %p746_p11 = por %p745_p10, %p744_p9 }
 0x1db   :  { %293 = vmax.xlane.f32.xlu1 %v292_v47  ;;  %395 = vmax.xlane.f32.xlu0 %v394_v48 }
 0x1dc   :  { %p747_p12 = pnand %p746_p11, %p740_p8 }
 0x264   :  { %v291_v49 = vpop.xlane.xlu1 %290  ;;  %v393_v50 = vpop.xlane.xlu0 %392 }
 0x265   :  { %v295_v51 = vsub.f32 %v286_v35, %v291_v49  ;;  %v397_v52 = vsub.f32 %v389_v36, %v393_v50 }
 0x267   :  { %v399_v53 = vmul.f32 1.442695, %v397_v52  ;;  %v297_v54 = vmul.f32 1.442695, %v295_v51 }
 0x268   :  { %v294_v55 = vpop.xlane.xlu1 %293  ;;  %v396_v56 = vpop.xlane.xlu0 %395 }
 0x269   :  { %v296_v57 = vsub.f32 %v287_v43, %v294_v55  ;;  %v398_v58 = vsub.f32 %v390_v44, %v396_v56  ;;  %701 = vpow2.f32 %v399_v53 }
 0x26a   :  { %703 = vpow2.f32 %v297_v54 }
 0x26b   :  { %v401_v59 = vmul.f32 1.442695, %v398_v58  ;;  %v299_v60 = vmul.f32 1.442695, %v296_v57 }
 0x26d   :  { %705 = vpow2.f32 %v401_v59 }
 0x26e   :  { %707 = vpow2.f32 %v299_v60 }
 0x273   :  { %v702_v61 = vpop.eup %701 }
 0x274   :  { %v403_v62 = vsel %vm288_vm2, %v702_v61, 0.0  ;;  %v704_v63 = vpop.eup %703 }
 0x275   :  { %404 = vadd.xlane.f32.xlu0 %v403_v62  ;;  %v301_v3 = vsel %vm288_vm2, %v704_v63, 0.0 }
 0x277   :  { %v706_v2 = vpop.eup %705 }
 0x278   :  { %v406_v4 = vsel %vm288_vm2, %v706_v2, 0.0  ;;  %v708_v5 = vpop.eup %707 }
 0x279   :  { %302 = vadd.xlane.f32.xlu0 %v301_v3  ;;  %407 = vadd.xlane.f32.xlu1 %v406_v4  ;;  %v304_v6 = vsel %vm288_vm2, %v708_v5, 0.0 }
 0x27d   :  { %305 = vadd.xlane.f32.xlu1 %v304_v6 }
 0x302   :  { %v405_v8 = vpop.xlane.xlu0 %404 }
 0x303   :  { %709 = vrcp.f32 %v405_v8 }
 0x306   :  { %v408_v9 = vpop.xlane.xlu1 %407  ;;  %v303_v10 = vpop.xlane.xlu0 %302 }
 0x307   :  { %711 = vrcp.f32 %v408_v9 }
 0x308   :  { %713 = vrcp.f32 %v303_v10 }
 0x30a   :  { %v306_v11 = vpop.xlane.xlu1 %305 }
 0x30b   :  { %715 = vrcp.f32 %v306_v11 }
 0x30d   :  { %v710_v12 = vpop.eup %709 }
 0x30e   :  { %v411_v13 = vmul.f32 %v710_v12, %v702_v61 }
 0x310   :  { %426 = vperm.xlu0 %675, %v411_v13  }
 0x311   :  { %v712_v14 = vpop.eup %711 }
 0x312   :  { %v412_v15 = vmul.f32 %v712_v14, %v706_v2  ;;  %v714_v16 = vpop.eup %713 }
 0x313   :  { %v309_v19 = vmul.f32 %v714_v16, %v704_v63 }
 0x314   :  { %430 = vperm.xlu1 %676, %v412_v15   ;;  %678 = vset.pattern.permute.xlu0 %v768_v0 }
 0x315   :  { %v716_v17 = vpop.eup %715 }
 0x316   :  { %v310_v18 = vmul.f32 %v716_v17, %v708_v5 }
 0x318   :  { %318 = vperm.xlu0 %678, %v310_v18   ;;  %324 = vperm.xlu1 %676, %v309_v19  }
 0x31c   :  { %328 = vperm.xlu1 %676, %v310_v18   ;;  %679 = vset.pattern.permute.xlu0 %v771_v7 }
 0x320   :  { %677 = vset.pattern.permute.xlu1 %v768_v0 }
 0x321   :  { %415 = vperm.xlu1 %677, %v411_v13  }
 0x325   :  { %420 = vperm.xlu1 %677, %v412_v15  }
 0x38f   :  { %v427_v22 = vpop.permute.xlu0 %426 }
 0x390   :  { %v433_v23 = vmul.f32 %v427_v22, %v886_v26 }
 0x392   :  { %437 = vrot.lane.b32.xlu1 %v433_v23, %s772_s8 }
 0x393   :  { %v431_v24 = vpop.permute.xlu1 %430 }
 0x394   :  { %v434_v0 = vmul.f32 %v431_v24, %v888_v30 }
 0x396   :  { %439 = vrot.lane.b32.xlu1 %v434_v0, %s772_s8 }
 0x397   :  { %v325_v25 = vpop.permute.xlu1 %324  ;;  %v319_v43 = vpop.permute.xlu0 %318 }
 0x398   :  { %v331_v27 = vmul.f32 %v325_v25, %v886_v26  ;;  %v322_v45 = vmul.f32 %v319_v43, %v888_v30 }
 0x39a   :  { %313 = vperm.xlu1 %677, %v309_v19  }
 0x39b   :  { %v329_v28 = vpop.permute.xlu1 %328 }
 0x39c   :  { %v332_v29 = vmul.f32 %v329_v28, %v888_v30 }
 0x39e   :  { %335 = vrot.lane.b32.xlu1 %v331_v27, %s772_s8 }
 0x3a0   :  { %v416_v31 = vpop.permute.xlu1 %415 }
 0x3a1   :  { %v423_v34 = vmul.f32 %v416_v31, %v886_v26 }
 0x3a2   :  { %337 = vrot.lane.b32.xlu1 %v332_v29, %s772_s8 }
 0x3a4   :  { %v421_v32 = vpop.permute.xlu1 %420 }
 0x3a5   :  { %v424_v35 = vmul.f32 %v421_v32, %v888_v30 }
 0x404   :  { %v438_v33 = vpop.permute.xlu1 %437 }
 0x405   :  { %v443_v38 = vadd.f32 %v438_v33, %v423_v34 }
 0x408   :  { %v440_v36 = vpop.permute.xlu1 %439 }
 0x409   :  { %v444_v39 = vadd.f32 %v440_v36, %v424_v35 }
 0x40b   :  { %v445_v40 = vpack.c.bf16 %v444_v39, %v443_v38 }
 0x40d   :  { %651 = vmatmul.mubr.msk.bf16.vlgmr.msra.gmra.mrb[4].mxu0 %vm448_vm4, %v445_v40 }
 0x40e   :  { %655 = vmatpush3.bf16.msra.mxu0 %v501_v41  ;;  %656 = vmatprep.mubr.msk.bf16.mxu0 %vm770_vm1, %v769_v1 }
 0x419   :  { %v314_v42 = vpop.permute.xlu1 %313 }
 0x41a   :  { %v321_v46 = vmul.f32 %v314_v42, %v886_v26 }
 0x41d   :  { %v336_v44 = vpop.permute.xlu1 %335 }
 0x41e   :  { %v341_v48 = vadd.f32 %v336_v44, %v321_v46 }
 0x421   :  { %v338_v47 = vpop.permute.xlu1 %337 }
 0x422   :  { %v342_v49 = vadd.f32 %v338_v47, %v322_v45 }
 0x424   :  { %v343_v50 = vpack.c.bf16 %v342_v49, %v341_v48 }
 0x426   :  { %657 = vmatmul.mubr.msk.bf16.vlgmr.msra.gmra.mrb[4].mxu0 %vm448_vm4, %v343_v50 }
 0x4f9   :  { %v537_v51 = vpop.f32.mrb[4].mxu0 }
 0x4fa   :  { %545 = vst.msk [vmem:[#allocation5] sm:$0xff] %vm544_vm5, %v537_v51  ;;  %v658_v52 = vpop.f32.mrb[5].mxu0 }
 0x4fb   :  { %v540_v1 = vpop.f32.mrb[6].mxu0 }
 0x4fc   :  { %546 = vst.msk [vmem:[#allocation5 + $0x8] sm:$0xff] %vm544_vm5, %v540_v1  ;;  %v659_v53 = vpop.f32.mrb[7].mxu0 }
 0x4fd   :  { %750 = shalt.err (!%p747_p12)
}
 0x4fe   :  { %s751_s14 = scalar_lea.hbm %s937_s4, 256 }
 0x4ff   :  { %p752_p13 = scmp.ne.s32.totalorder %s937_s4, %s751_s14  ;;  %p755_p0 = scmp.lt.u32.totalorder %s751_s14, %s937_s4 }
 0x501   :  { %p757_p1 = pnand %p755_p0, %p752_p13 }
 0x503   :  { %760 = shalt.err (!%p757_p1)
}
 0x504   :  { %s774_s19 = smov 128   ;;  %s775_s20 = smov 8  }
 0x505   :  { %558 = dma.vmem_to_hbm [thread:$0]  %s553_s10, 256, %s937_s4, [#allocation4], %s774_s19, %s774_s19, %s775_s20  }
 0x506   :  { %763 = dma.done.wait [#allocation4], 256  }
 0x507   :  { %764 = vsyncadd [#allocation4], 4294967040 }
 0x508   :  { %562 = vsyncpa [#allocation3], 1 }
 0x509   :  { %563 = vsyncpa [#allocation4], 1 }

// kernel: tpu_custom_call.1
= control target key start
LH: loop header
LB: loop body
LE: loop exit
PB: predicated region body
PF: predicated region fallthrough
CT: control target
= control target key end

     0   :  { %9 = vsyncpa [#allocation3], 0  ;;  %s933_s0 = inlined_call_operand.hbm [shape: bf16[16,32], index: 0, kind: input, shape index: {}]   ;;  %s934_s1 = inlined_call_operand.vmem [shape: bf16[32,512], index: 1, kind: input, shape index: {}]   ;;  %s935_s2 = inlined_call_operand.vmem [shape: bf16[128,2], index: 2, kind: input, shape index: {}]   ;;  %s936_s3 = inlined_call_operand.vmem [shape: bf16[2,8,16], index: 3, kind: input, shape index: {}]   ;;  %s937_s4 = inlined_call_operand.hbm [shape: f32[16,16], index: 4, kind: output, shape index: {}]  }
   0x1   :  { %10 = vsyncpa [#allocation4], 0  ;;  %s765_s15 = smov [#allocation2]   ;;  %s717_s19 = scalar_lea.hbm %s933_s0, 128 }
   0x2   :  { %s16_s16 = sshll.u32 %s765_s15, 4  ;;  %p718_p0 = scmp.ne.s32.totalorder %s933_s0, %s717_s19  ;;  %s17_s16 = int_to_ptr.vmem [resolvable:$true] %s16_s16 }
   0x3   :  { %p721_p1 = scmp.lt.u32.totalorder %s717_s19, %s933_s0 }
   0x5   :  { %p723_p2 = pnand %p721_p1, %p718_p0 }
   0x7   :  { %726 = shalt.err (!%p723_p2)
}
   0x8   :  { %s727_s24 = scalar_lea.vmem %s17_s16, 128  ;;  %p732_p4 = scmp.lt.s32.totalorder %s17_s16, %s17_s16 }
   0x9   :  { %p728_p3 = scmp.ne.s32.totalorder %s17_s16, %s727_s24  ;;  %p733_p5 = scmp.lt.s32.totalorder %s727_s24, %s727_s24 }
   0xb   :  { %p734_p6 = por %p733_p5, %p732_p4 }
   0xd   :  { %p735_p7 = pnand %p734_p6, %p728_p3 }
   0xf   :  { %738 = shalt.err (!%p735_p7)
}
  0x10   :  { %s766_s25 = smov 64   ;;  %s767_s26 = smov 4  }
  0x11   :  { %22 = dma.hbm_to_vmem [thread:$0]  %s933_s0, 128, %s17_s16, [#allocation3], %s766_s25, %s766_s25, %s767_s26  }
  0x12   :  { %761 = dma.done.wait [#allocation3], 128  }
  0x13   :  { %762 = vsyncadd [#allocation3], 4294967168  ;;  %v768_v0 = vmov 0   ;;  %v769_v1 = vmov 0.0   ;;  %v680_v2 = vld [vmem:[%s934_s1 + $0x4] ss:$16 sps:$4 sm:$0xff]  }
  0x14   :  { %124 = vmatprep.mubr.bf16.mxu1 %v768_v0  ;;  %608 = vmatprep.subr.bf16.mxu0 %v769_v1  ;;  %v682_v3 = vld [vmem:[%s934_s1] ss:$16 sps:$4 sm:$0xff]   ;;  %v683_v4 = vld [vmem:[%s934_s1 + $0x24] ss:$16 sps:$4 sm:$0xff]   ;;  %v689_v6 = vld [vmem:[%s934_s1 + $0xc] ss:$16 sps:$4 sm:$0xff]  }
  0x15   :  { %92 = vmatprep.subr.bf16.mxu1 %v680_v2  ;;  %v685_v5 = vld [vmem:[%s934_s1 + $0x20] ss:$16 sps:$4 sm:$0xff]   ;;  %v687_v8 = vld [vmem:[%s934_s1 + $0x8] ss:$16 sps:$4 sm:$0xff]   ;;  %vm88_vm0 = vcmask 261120   ;;  %vm770_vm1 = vmmov 0  }
  0x16   :  { %93 = vmatpush1.bf16.msra.mxu1 %v682_v3  ;;  %v686_v7 = vld [vmem:[#allocation2] sm:$0xff]   ;;  %v692_v10 = vld [vmem:[%s934_s1 + $0x2c] ss:$16 sps:$4 sm:$0xff]   ;;  %v690_v12 = vld [vmem:[%s934_s1 + $0x28] ss:$16 sps:$4 sm:$0xff]   ;;  %624 = vmatprep.mubr.msk.bf16.mxu0 %vm770_vm1, %v769_v1  ;;  %vm288_vm2 = vcmask 15360  }
  0x17   :  { %94 = vmatprep.subr.bf16.mxu1 %v683_v4  ;;  %v693_v9 = vld [vmem:[%s935_s2] sm:$0xff]   ;;  %v694_v11 = vld [vmem:[%s935_s2 + $0x8] sm:$0xff]   ;;  %v695_v13 = vld [vmem:[%s935_s2 + $0x10] sm:$0xff]   ;;  %vm452_vm3 = vcmask 1043456   ;;  %s772_s8 = smov 120   ;;  %vm448_vm4 = vcmask 64512  }
  0x18   :  { %609 = vmatpush3.bf16.msra.mxu0 %v693_v9  ;;  %v696_v14 = vld [vmem:[%s935_s2 + $0x18] sm:$0xff]   ;;  %v697_v15 = vld [vmem:[%s935_s2 + $0x20] sm:$0xff]   ;;  %v698_v16 = vld [vmem:[%s935_s2 + $0x28] sm:$0xff]   ;;  %vm544_vm5 = vcmask 130048  }
  0x19   :  { %610 = vmatprep.subr.bf16.mxu0 %v769_v1  ;;  %v699_v17 = vld [vmem:[%s935_s2 + $0x30] sm:$0xff]   ;;  %v700_v18 = vld [vmem:[%s935_s2 + $0x38] sm:$0xff]  }
  0x1a   :  { %95 = vmatpush1.bf16.msra.mxu1 %v685_v5 }
  0x1b   :  { %135 = vmatprep.subr.bf16.mxu1 %v689_v6 }
  0x1c   :  { %611 = vmatpush3.bf16.msra.mxu0 %v694_v11 }
  0x1d   :  { %573 = vmatmul.mubr.msk.bf16.vlgmr.msra.gmra.mrb[0].mxu1 %vm88_vm0, %v686_v7  ;;  %612 = vmatprep.subr.bf16.mxu0 %v769_v1 }
  0x1e   :  { %136 = vmatpush1.bf16.msra.mxu1 %v687_v8  ;;  %167 = vmatprep.mubr.bf16.mxu1 %v768_v0 }
  0x1f   :  { %137 = vmatprep.subr.bf16.mxu1 %v692_v10 }
  0x20   :  { %613 = vmatpush3.bf16.msra.mxu0 %v695_v13 }
  0x21   :  { %614 = vmatprep.subr.bf16.mxu0 %v769_v1 }
  0x22   :  { %138 = vmatpush1.bf16.msra.mxu1 %v690_v12 }
  0x23   :  { %628 = vmatprep.subr.bf16.mxu1 %v769_v1 }
  0x24   :  { %615 = vmatpush3.bf16.msra.mxu0 %v696_v14 }
  0x25   :  { %574 = vmatmul.mubr.msk.bf16.vlgmr.msra.gmra.mrb[4].mxu1 %vm88_vm0, %v686_v7  ;;  %616 = vmatprep.subr.bf16.mxu0 %v769_v1  ;;  %v771_v7 = vmov 1  }
  0x26   :  { %629 = vmatpush3.bf16.msra.mxu1 %v693_v9  ;;  %644 = vmatprep.mubr.msk.bf16.mxu1 %vm770_vm1, %v769_v1 }
  0x27   :  { %630 = vmatprep.subr.bf16.mxu1 %v769_v1  ;;  %675 = vset.pattern.permute.xlu0 %v771_v7 }
  0x28   :  { %617 = vmatpush3.bf16.msra.mxu0 %v697_v15  ;;  %676 = vset.pattern.permute.xlu1 %v771_v7 }
  0x29   :  { %618 = vmatprep.subr.bf16.mxu0 %v769_v1 }
  0x2a   :  { %631 = vmatpush3.bf16.msra.mxu1 %v694_v11 }
  0x2b   :  { %632 = vmatprep.subr.bf16.mxu1 %v769_v1 }
  0x2c   :  { %619 = vmatpush3.bf16.msra.mxu0 %v698_v16 }
  0x2d   :  { %620 = vmatprep.subr.bf16.mxu0 %v769_v1 }
  0x2e   :  { %633 = vmatpush3.bf16.msra.mxu1 %v695_v13 }
  0x2f   :  { %634 = vmatprep.subr.bf16.mxu1 %v769_v1 }
  0x30   :  { %621 = vmatpush3.bf16.msra.mxu0 %v699_v17 }
  0x31   :  { %622 = vmatprep.subr.bf16.mxu0 %v769_v1 }
  0x32   :  { %635 = vmatpush3.bf16.msra.mxu1 %v696_v14 }
  0x33   :  { %636 = vmatprep.subr.bf16.mxu1 %v769_v1 }
  0x34   :  { %623 = vmatpush3.bf16.msra.mxu0 %v700_v18 }
  0x35   :  { %648 = vmatprep.subr.bf16.mxu0 %v769_v1 }
  0x36   :  { %637 = vmatpush3.bf16.msra.mxu1 %v697_v15 }
  0x37   :  { %638 = vmatprep.subr.bf16.mxu1 %v769_v1 }
  0x3a   :  { %639 = vmatpush3.bf16.msra.mxu1 %v698_v16 }
  0x3b   :  { %640 = vmatprep.subr.bf16.mxu1 %v769_v1 }
  0x3e   :  { %641 = vmatpush3.bf16.msra.mxu1 %v699_v17 }
  0x3f   :  { %642 = vmatprep.subr.bf16.mxu1 %v769_v1 }
  0x42   :  { %643 = vmatpush3.bf16.msra.mxu1 %v700_v18 }
  0xf0   :  { %v126_v19 = vpop.f32.mrb[0].mxu1 }
  0xf1   :  { %v128_v20 = vpop.f32.mrb[1].mxu1 }
  0xf2   :  { %v130_v21 = vpop.f32.mrb[2].mxu1 }
  0xf3   :  { %v132_v22 = vpop.f32.mrb[3].mxu1 }
  0xf8   :  { %v169_v23 = vpop.f32.mrb[4].mxu1 }
  0xf9   :  { %v194_v24 = vmul.f32 %v169_v23, %v126_v19  ;;  %v345_v25 = vmul.f32 %v169_v23, %v128_v20  ;;  %v886_v26 = vpop.f32.mrb[5].mxu1  ;;  %v583_v20 = vld [vmem:[%s936_s3 + $0x4] sm:$0xf] }
  0xfa   :  { %v173_v27 = vpop.f32.mrb[6].mxu1 }
  0xfb   :  { %v195_v28 = vmul.f32 %v173_v27, %v130_v21  ;;  %v346_v29 = vmul.f32 %v173_v27, %v132_v22  ;;  %v888_v30 = vpop.f32.mrb[7].mxu1  ;;  %v454_v21 = vsel %vm452_vm3, %v583_v20, 0 }
  0xfd   :  { %v196_v31 = vpack.c.bf16 %v195_v28, %v194_v24  ;;  %v347_v32 = vpack.c.bf16 %v346_v29, %v345_v25 }
  0xff   :  { %625 = vmatmul.mubr.bf16.vlgmr.msra.gmra.mrb[0].mxu0 %v196_v31  ;;  %645 = vmatmul.mubr.bf16.vlgmr.msra.gmra.mrb[8].mxu1 %v347_v32 }
 0x100   :  { %650 = vmatprep.mubr.msk.bf16.mxu0 %vm770_vm1, %v769_v1  ;;  %649 = vmatpush3.bf16.msra.mxu0 %v454_v21 }
 0x101   :  { %654 = vmatprep.subr.bf16.mxu0 %v769_v1 }
 0x1d2   :  { %v279_v33 = vpop.f32.mrb[0].mxu0  ;;  %v382_v34 = vpop.f32.mrb[8].mxu1 }
 0x1d3   :  { %v286_v35 = vmul.f32 0.35355338, %v279_v33  ;;  %v389_v36 = vmul.f32 0.35355338, %v382_v34  ;;  %v626_v37 = vpop.f32.mrb[1].mxu0  ;;  %v646_v38 = vpop.f32.mrb[9].mxu1 }
 0x1d4   :  { %v282_v39 = vpop.f32.mrb[2].mxu0  ;;  %v385_v40 = vpop.f32.mrb[10].mxu1  ;;  %v344_v37 = vld [vmem:[%s936_s3] sm:$0xf]  ;;  %s773_s3 = smov [#allocation5]  }
 0x1d5   :  { %v627_v41 = vpop.f32.mrb[3].mxu0  ;;  %v647_v42 = vpop.f32.mrb[11].mxu1  ;;  %v287_v43 = vmul.f32 0.35355338, %v282_v39  ;;  %v390_v44 = vmul.f32 0.35355338, %v385_v40 }
 0x1d6   :  { %v289_v45 = vsel %vm288_vm2, %v286_v35, -inf  ;;  %v391_v46 = vsel %vm288_vm2, %v389_v36, -inf  ;;  %v501_v41 = vsel %vm452_vm3, %v344_v37, 0  ;;  %s552_s10 = sshll.u32 %s773_s3, 4  ;;  %s553_s10 = int_to_ptr.vmem [resolvable:$true] %s552_s10 }
 0x1d7   :  { %290 = vmax.xlane.f32.xlu1 %v289_v45  ;;  %392 = vmax.xlane.f32.xlu0 %v391_v46  ;;  %v292_v47 = vsel %vm288_vm2, %v287_v43, -inf  ;;  %v394_v48 = vsel %vm288_vm2, %v390_v44, -inf  ;;  %s739_s11 = scalar_lea.vmem %s553_s10, 256  ;;  %p744_p9 = scmp.lt.s32.totalorder %s553_s10, %s553_s10 }
 0x1d8   :  { %p740_p8 = scmp.ne.s32.totalorder %s553_s10, %s739_s11  ;;  %p745_p10 = scmp.lt.s32.totalorder %s739_s11, %s739_s11 }
 0x1da   :  { %p746_p11 = por %p745_p10, %p744_p9 }
 0x1db   :  { %293 = vmax.xlane.f32.xlu1 %v292_v47  ;;  %395 = vmax.xlane.f32.xlu0 %v394_v48 }
 0x1dc   :  { %p747_p12 = pnand %p746_p11, %p740_p8 }
 0x264   :  { %v291_v49 = vpop.xlane.xlu1 %290  ;;  %v393_v50 = vpop.xlane.xlu0 %392 }
 0x265   :  { %v295_v51 = vsub.f32 %v286_v35, %v291_v49  ;;  %v397_v52 = vsub.f32 %v389_v36, %v393_v50 }
 0x267   :  { %v399_v53 = vmul.f32 1.442695, %v397_v52  ;;  %v297_v54 = vmul.f32 1.442695, %v295_v51 }
 0x268   :  { %v294_v55 = vpop.xlane.xlu1 %293  ;;  %v396_v56 = vpop.xlane.xlu0 %395 }
 0x269   :  { %v296_v57 = vsub.f32 %v287_v43, %v294_v55  ;;  %v398_v58 = vsub.f32 %v390_v44, %v396_v56  ;;  %701 = vpow2.f32 %v399_v53 }
 0x26a   :  { %703 = vpow2.f32 %v297_v54 }
 0x26b   :  { %v401_v59 = vmul.f32 1.442695, %v398_v58  ;;  %v299_v60 = vmul.f32 1.442695, %v296_v57 }
 0x26d   :  { %705 = vpow2.f32 %v401_v59 }
 0x26e   :  { %707 = vpow2.f32 %v299_v60 }
 0x273   :  { %v702_v61 = vpop.eup %701 }
 0x274   :  { %v403_v62 = vsel %vm288_vm2, %v702_v61, 0.0  ;;  %v704_v63 = vpop.eup %703 }
 0x275   :  { %404 = vadd.xlane.f32.xlu0 %v403_v62  ;;  %v301_v3 = vsel %vm288_vm2, %v704_v63, 0.0 }
 0x277   :  { %v706_v2 = vpop.eup %705 }
 0x278   :  { %v406_v4 = vsel %vm288_vm2, %v706_v2, 0.0  ;;  %v708_v5 = vpop.eup %707 }
 0x279   :  { %302 = vadd.xlane.f32.xlu0 %v301_v3  ;;  %407 = vadd.xlane.f32.xlu1 %v406_v4  ;;  %v304_v6 = vsel %vm288_vm2, %v708_v5, 0.0 }
 0x27d   :  { %305 = vadd.xlane.f32.xlu1 %v304_v6 }
 0x302   :  { %v405_v8 = vpop.xlane.xlu0 %404 }
 0x303   :  { %709 = vrcp.f32 %v405_v8 }
 0x306   :  { %v408_v9 = vpop.xlane.xlu1 %407  ;;  %v303_v10 = vpop.xlane.xlu0 %302 }
 0x307   :  { %711 = vrcp.f32 %v408_v9 }
 0x308   :  { %713 = vrcp.f32 %v303_v10 }
 0x30a   :  { %v306_v11 = vpop.xlane.xlu1 %305 }
 0x30b   :  { %715 = vrcp.f32 %v306_v11 }
 0x30d   :  { %v710_v12 = vpop.eup %709 }
 0x30e   :  { %v411_v13 = vmul.f32 %v710_v12, %v702_v61 }
 0x310   :  { %426 = vperm.xlu0 %675, %v411_v13  }
 0x311   :  { %v712_v14 = vpop.eup %711 }
 0x312   :  { %v412_v15 = vmul.f32 %v712_v14, %v706_v2  ;;  %v714_v16 = vpop.eup %713 }
 0x313   :  { %v309_v19 = vmul.f32 %v714_v16, %v704_v63 }
 0x314   :  { %430 = vperm.xlu1 %676, %v412_v15   ;;  %678 = vset.pattern.permute.xlu0 %v768_v0 }
 0x315   :  { %v716_v17 = vpop.eup %715 }
 0x316   :  { %v310_v18 = vmul.f32 %v716_v17, %v708_v5 }
 0x318   :  { %318 = vperm.xlu0 %678, %v310_v18   ;;  %324 = vperm.xlu1 %676, %v309_v19  }
 0x31c   :  { %328 = vperm.xlu1 %676, %v310_v18   ;;  %679 = vset.pattern.permute.xlu0 %v771_v7 }
 0x320   :  { %677 = vset.pattern.permute.xlu1 %v768_v0 }
 0x321   :  { %415 = vperm.xlu1 %677, %v411_v13  }
 0x325   :  { %420 = vperm.xlu1 %677, %v412_v15  }
 0x38f   :  { %v427_v22 = vpop.permute.xlu0 %426 }
 0x390   :  { %v433_v23 = vmul.f32 %v427_v22, %v886_v26 }
 0x392   :  { %437 = vrot.lane.b32.xlu1 %v433_v23, %s772_s8 }
 0x393   :  { %v431_v24 = vpop.permute.xlu1 %430 }
 0x394   :  { %v434_v0 = vmul.f32 %v431_v24, %v888_v30 }
 0x396   :  { %439 = vrot.lane.b32.xlu1 %v434_v0, %s772_s8 }
 0x397   :  { %v325_v25 = vpop.permute.xlu1 %324  ;;  %v319_v43 = vpop.permute.xlu0 %318 }
 0x398   :  { %v331_v27 = vmul.f32 %v325_v25, %v886_v26  ;;  %v322_v45 = vmul.f32 %v319_v43, %v888_v30 }
 0x39a   :  { %313 = vperm.xlu1 %677, %v309_v19  }
 0x39b   :  { %v329_v28 = vpop.permute.xlu1 %328 }
 0x39c   :  { %v332_v29 = vmul.f32 %v329_v28, %v888_v30 }
 0x39e   :  { %335 = vrot.lane.b32.xlu1 %v331_v27, %s772_s8 }
 0x3a0   :  { %v416_v31 = vpop.permute.xlu1 %415 }
 0x3a1   :  { %v423_v34 = vmul.f32 %v416_v31, %v886_v26 }
 0x3a2   :  { %337 = vrot.lane.b32.xlu1 %v332_v29, %s772_s8 }
 0x3a4   :  { %v421_v32 = vpop.permute.xlu1 %420 }
 0x3a5   :  { %v424_v35 = vmul.f32 %v421_v32, %v888_v30 }
 0x404   :  { %v438_v33 = vpop.permute.xlu1 %437 }
 0x405   :  { %v443_v38 = vadd.f32 %v438_v33, %v423_v34 }
 0x408   :  { %v440_v36 = vpop.permute.xlu1 %439 }
 0x409   :  { %v444_v39 = vadd.f32 %v440_v36, %v424_v35 }
 0x40b   :  { %v445_v40 = vpack.c.bf16 %v444_v39, %v443_v38 }
 0x40d   :  { %651 = vmatmul.mubr.msk.bf16.vlgmr.msra.gmra.mrb[4].mxu0 %vm448_vm4, %v445_v40 }
 0x40e   :  { %655 = vmatpush3.bf16.msra.mxu0 %v501_v41  ;;  %656 = vmatprep.mubr.msk.bf16.mxu0 %vm770_vm1, %v769_v1 }
 0x419   :  { %v314_v42 = vpop.permute.xlu1 %313 }
 0x41a   :  { %v321_v46 = vmul.f32 %v314_v42, %v886_v26 }
 0x41d   :  { %v336_v44 = vpop.permute.xlu1 %335 }
 0x41e   :  { %v341_v48 = vadd.f32 %v336_v44, %v321_v46 }
 0x421   :  { %v338_v47 = vpop.permute.xlu1 %337 }
 0x422   :  { %v342_v49 = vadd.f32 %v338_v47, %v322_v45 }
 0x424   :  { %v343_v50 = vpack.c.bf16 %v342_v49, %v341_v48 }
 0x426   :  { %657 = vmatmul.mubr.msk.bf16.vlgmr.msra.gmra.mrb[4].mxu0 %vm448_vm4, %v343_v50 }
 0x4f9   :  { %v537_v51 = vpop.f32.mrb[4].mxu0 }
 0x4fa   :  { %545 = vst.msk [vmem:[#allocation5] sm:$0xff] %vm544_vm5, %v537_v51  ;;  %v658_v52 = vpop.f32.mrb[5].mxu0 }
 0x4fb   :  { %v540_v1 = vpop.f32.mrb[6].mxu0 }
 0x4fc   :  { %546 = vst.msk [vmem:[#allocation5 + $0x8] sm:$0xff] %vm544_vm5, %v540_v1  ;;  %v659_v53 = vpop.f32.mrb[7].mxu0 }
 0x4fd   :  { %750 = shalt.err (!%p747_p12)
}
 0x4fe   :  { %s751_s14 = scalar_lea.hbm %s937_s4, 256 }
 0x4ff   :  { %p752_p13 = scmp.ne.s32.totalorder %s937_s4, %s751_s14  ;;  %p755_p0 = scmp.lt.u32.totalorder %s751_s14, %s937_s4 }
 0x501   :  { %p757_p1 = pnand %p755_p0, %p752_p13 }
 0x503   :  { %760 = shalt.err (!%p757_p1)
}
 0x504   :  { %s774_s19 = smov 128   ;;  %s775_s20 = smov 8  }
 0x505   :  { %558 = dma.vmem_to_hbm [thread:$0]  %s553_s10, 256, %s937_s4, [#allocation4], %s774_s19, %s774_s19, %s775_s20  }
 0x506   :  { %763 = dma.done.wait [#allocation4], 256  }
 0x507   :  { %764 = vsyncadd [#allocation4], 4294967040 }
 0x508   :  { %562 = vsyncpa [#allocation3], 1 }
 0x509   :  { %563 = vsyncpa [#allocation4], 1 }

</bundles_post_ra>
